<compile_context>
chip_gen: v7x
topology: tpu7x:2x2x1
jax: 0.10.0
libtpu: 0.0.40
codegen_flags: <defaults>
</compile_context>

<pallas_src>
import functools

import jax
import jax.numpy as jnp
from jax import lax
from jax.experimental import pallas as pl
from jax.experimental.pallas import tpu as pltpu


def _combined_ce_kernel(logits_ref, targets_ref, w_ref,
                        total_ref, dimloss_ref,
                        loss_sum_sc, count_sc,
                        *, batch, tb):
    step = pl.program_id(0)

    # Zero the accumulators on the first batch tile.
    @pl.when(step == 0)
    def _init():
        loss_sum_sc[...] = jnp.zeros_like(loss_sum_sc)
        count_sc[...] = jnp.zeros_like(count_sc)

    # Cast to f32 after the load (inputs may be bf16 -> half the HBM traffic).
    logits = logits_ref[...].astype(jnp.float32)      # [T, TB, C]
    targets = targets_ref[...].astype(jnp.float32)    # [T, TB, C]
    t_dim, tb_dim, _ = logits.shape

    # Per-(task, sample) validity: no NaN across the class block AND the row
    # is inside the real batch (the last tile may be padded past B).
    tgt_is_nan = jnp.isnan(targets)                               # [T, TB, C]
    has_nan = jnp.any(tgt_is_nan, axis=-1)                        # [T, TB]
    row_ids = lax.broadcasted_iota(jnp.int32, (t_dim, tb_dim), 1)
    row_ok = (step * tb + row_ids) < batch                        # [T, TB]
    mask = jnp.logical_and(jnp.logical_not(has_nan), row_ok)      # [T, TB]
    maskf = mask.astype(jnp.float32)

    # Stable log_softmax over the class (lane) axis.
    m = jnp.max(logits, axis=-1, keepdims=True)
    shifted = logits - m
    lse = jnp.log(jnp.sum(jnp.exp(shifted), axis=-1, keepdims=True))
    log_probs = shifted - lse                                     # [T, TB, C]

    # nan_to_num(targets) and soft-label cross entropy per (task, sample).
    tgt = jnp.where(tgt_is_nan, 0.0, targets)
    ce = -jnp.sum(tgt * log_probs, axis=-1)                       # [T, TB]

    # Select (not multiply) so NaN/Inf from padded rows cannot leak through.
    masked_ce = jnp.where(mask, ce, 0.0)

    # Accumulate partial sums across batch tiles (clamp/divide happen only at
    # the end, AFTER all tiles have contributed).
    loss_sum_sc[...] += jnp.sum(masked_ce, axis=-1, keepdims=True)  # [T, 1]
    count_sc[...] += jnp.sum(maskf, axis=-1, keepdims=True)         # [T, 1]

    # Finalize on the last batch tile.
    @pl.when(step == pl.num_programs(0) - 1)
    def _finalize():
        counts = count_sc[...]                                    # [T, 1]
        valid_samples = jnp.maximum(counts, 1.0)                  # clamp(min=1)
        dim_losses = loss_sum_sc[...] / valid_samples             # [T, 1]
        valid_dims = (counts > 0.0).astype(jnp.float32)           # mask.any(0)
        w_eff = w_ref[...] * valid_dims                           # [T, 1]
        weight_sum = jnp.maximum(jnp.sum(w_eff, keepdims=True), 1e-8)  # [1, 1]
        weighted = w_eff * dim_losses                             # [T, 1]
        dimloss_ref[...] = weighted
        total_ref[...] = jnp.sum(weighted, keepdims=True) / weight_sum


def combined_ce_loss(logits, targets, norm_weights, num_tasks, num_classes,
                     tb=16):
    """Pallas wrapper. Returns (total_loss scalar, weighted dim_losses [T])."""
    B = logits.shape[0]
    T, C = num_tasks, num_classes

    # Layout plumbing in the wrapper (free / XLA-side): [B, T*C] -> [T, B, C]
    # so the class axis lands on lanes and the batch tile on sublanes.
    lg = logits.reshape(B, T, C).transpose(1, 0, 2)
    tg = targets.reshape(B, T, C).transpose(1, 0, 2)
    w = norm_weights.reshape(T, 1).astype(jnp.float32)

    grid = (pl.cdiv(B, tb),)

    total, dim_w = pl.pallas_call(
        functools.partial(_combined_ce_kernel, batch=B, tb=tb),
        out_shape=(
            jax.ShapeDtypeStruct((1, 1), jnp.float32),
            jax.ShapeDtypeStruct((T, 1), jnp.float32),
        ),
        grid=grid,
        in_specs=[
            pl.BlockSpec((T, tb, C), lambda i: (0, i, 0)),
            pl.BlockSpec((T, tb, C), lambda i: (0, i, 0)),
            pl.BlockSpec((T, 1), lambda i: (0, 0)),
        ],
        out_specs=(
            pl.BlockSpec((1, 1), lambda i: (0, 0)),
            pl.BlockSpec((T, 1), lambda i: (0, 0)),
        ),
        scratch_shapes=[
            pltpu.VMEM((T, 1), jnp.float32),   # masked CE partial sums
            pltpu.VMEM((T, 1), jnp.float32),   # valid-sample counts
        ],
        compiler_params=pltpu.CompilerParams(
            dimension_semantics=("arbitrary",),
        ),
    )(lg, tg, w)

    return total[0, 0], dim_w[:, 0]


def _reference(logits, targets, norm_weights, num_tasks, num_classes):
    """Plain-JAX mirror of the PyTorch forward, for a correctness check."""
    B = logits.shape[0]
    lg = logits.reshape(B, num_tasks, num_classes).astype(jnp.float32)
    tg = targets.reshape(B, num_tasks, num_classes).astype(jnp.float32)
    mask = ~jnp.any(jnp.isnan(tg), axis=-1)                       # [B, T]
    valid_samples = jnp.maximum(mask.sum(axis=0).astype(jnp.float32), 1.0)
    log_probs = jax.nn.log_softmax(lg, axis=-1)
    tg0 = jnp.nan_to_num(tg, nan=0.0)
    loss = -(tg0 * log_probs).sum(axis=-1)                        # [B, T]
    masked_loss = loss * mask.astype(jnp.float32)
    dim_losses = masked_loss.sum(axis=0) / valid_samples          # [T]
    valid_dims = jnp.any(mask, axis=0)
    w_eff = norm_weights * valid_dims.astype(jnp.float32)
    weight_sum = jnp.maximum(w_eff.sum(), 1e-8)
    dim_losses_w = w_eff * dim_losses                             # returned
    total = dim_losses_w.sum() / weight_sum
    return total, dim_losses_w


if __name__ == "__main__":
    key = jax.random.PRNGKey(0)
    B, T, C = 40, 2, 32            # batch=40 -> grid of 3 tiles (TB=16), ragged last tile
    TB = 16

    k1, k2, k3 = jax.random.split(key, 3)

    # bf16 logits: kernel casts in-kernel (no wrapper upcast -> half the DMA).
    logits = jax.random.normal(k1, (B, T * C), dtype=jnp.float32).astype(jnp.bfloat16)

    # Soft (one-hot) targets per task, with NaN-invalidated (sample, task) pairs.
    cls = jax.random.randint(k2, (B, T), 0, C)
    targets = jax.nn.one_hot(cls, C, dtype=jnp.float32).reshape(B, T * C)
    targets = targets.at[0, 0:C].set(jnp.nan)          # sample 0, task 0: whole block NaN
    targets = targets.at[3, C:2 * C].set(jnp.nan)      # sample 3, task 1: whole block NaN
    targets = targets.at[5, 2].set(jnp.nan)            # sample 5, task 0: single NaN -> still invalid
    targets = targets.at[17, C + 7].set(jnp.nan)       # sample 17, task 1: single NaN -> invalid

    # Module: weights registered as weights / weights.sum().
    raw_w = jnp.array([2.0, 1.0], dtype=jnp.float32)
    norm_w = raw_w / raw_w.sum()

    total_loss, dim_losses = combined_ce_loss(logits, targets, norm_w, T, C, tb=TB)
    jax.block_until_ready((total_loss, dim_losses))

    ref_total, ref_dims = _reference(logits, targets, norm_w, T, C)

    assert jnp.isfinite(total_loss)
    assert jnp.allclose(total_loss, ref_total, rtol=1e-4, atol=1e-5), (total_loss, ref_total)
    assert jnp.allclose(dim_losses, ref_dims, rtol=1e-4, atol=1e-5), (dim_losses, ref_dims)

    print("KERNEL_OK")
</pallas_src>

<mosaic_0001>
module attributes {stable_mosaic.version = 11 : i64} {
  func.func @_combined_ce_kernel(%arg0: i32, %arg1: memref<2x16x32xbf16, #tpu.memory_space<vmem>>, %arg2: memref<2x16x32xf32, #tpu.memory_space<vmem>>, %arg3: memref<2x1xf32, #tpu.memory_space<vmem>>, %arg4: memref<1x1xf32, #tpu.memory_space<vmem>>, %arg5: memref<2x1xf32, #tpu.memory_space<vmem>>, %arg6: memref<2x1xf32, #tpu.memory_space<vmem>>, %arg7: memref<2x1xf32, #tpu.memory_space<vmem>>) attributes {dimension_semantics = [#tpu.dimension_semantics<arbitrary>], iteration_bounds = array<i64: 3>, scalar_prefetch = 0 : i64, scratch_operands = 2 : i64, tpu.core_type = #tpu.core_type<tc>, window_params = [{transform_indices = @transform_0, window_bounds = array<i64: 2, 16, 32>}, {transform_indices = @transform_1, window_bounds = array<i64: 2, 16, 32>}, {pipeline_mode = #tpu.pipeline_mode<synchronous>, transform_indices = @transform_2, window_bounds = array<i64: 2, 1>}, {pipeline_mode = #tpu.pipeline_mode<synchronous>, transform_indices = @transform_3, window_bounds = array<i64: 1, 1>}, {pipeline_mode = #tpu.pipeline_mode<synchronous>, transform_indices = @transform_4, window_bounds = array<i64: 2, 1>}]} {
    %c0_i32 = arith.constant 0 : i32
    %0 = arith.cmpi eq, %arg0, %c0_i32 : i32
    %1 = arith.extui %0 : i1 to i32
    %c0_i32_0 = arith.constant 0 : i32
    %2 = arith.cmpi ne, %1, %c0_i32_0 : i32
    scf.if %2 {
      %cst_27 = arith.constant 0.000000e+00 : f32
      %54 = vector.broadcast %cst_27 : f32 to vector<2x1xf32>
      %c0_28 = arith.constant 0 : index
      %c0_29 = arith.constant 0 : index
      %55 = vector.load %arg6[%c0_28, %c0_29] : memref<2x1xf32, #tpu.memory_space<vmem>>, vector<2x1xf32>
      tpu.vector_store %arg6[%c0_28, %c0_29], %54 {strides = array<i32>} : memref<2x1xf32, #tpu.memory_space<vmem>>, vector<2x1xf32>,
      %cst_30 = arith.constant 0.000000e+00 : f32
      %56 = vector.broadcast %cst_30 : f32 to vector<2x1xf32>
      %c0_31 = arith.constant 0 : index
      %c0_32 = arith.constant 0 : index
      %57 = vector.load %arg7[%c0_31, %c0_32] : memref<2x1xf32, #tpu.memory_space<vmem>>, vector<2x1xf32>
      tpu.vector_store %arg7[%c0_31, %c0_32], %56 {strides = array<i32>} : memref<2x1xf32, #tpu.memory_space<vmem>>, vector<2x1xf32>,
    } else {
    }
    %c0 = arith.constant 0 : index
    %c0_1 = arith.constant 0 : index
    %c0_2 = arith.constant 0 : index
    %3 = vector.load %arg1[%c0, %c0_1, %c0_2] : memref<2x16x32xbf16, #tpu.memory_space<vmem>>, vector<2x16x32xbf16>
    %4 = arith.extf %3 : vector<2x16x32xbf16> to vector<2x16x32xf32>
    %c0_3 = arith.constant 0 : index
    %c0_4 = arith.constant 0 : index
    %c0_5 = arith.constant 0 : index
    %5 = vector.load %arg2[%c0_3, %c0_4, %c0_5] : memref<2x16x32xf32, #tpu.memory_space<vmem>>, vector<2x16x32xf32>
    %6 = arith.cmpf one, %5, %5 : vector<2x16x32xf32>
    %cst = arith.constant 1.000000e+00 : f32
    %cst_6 = arith.constant 0.000000e+00 : f32
    %7 = vector.broadcast %cst : f32 to vector<2x16x32xf32>
    %8 = vector.broadcast %cst_6 : f32 to vector<2x16x32xf32>
    %9 = arith.select %6, %7, %8 : vector<2x16x32xi1>, vector<2x16x32xf32>
    %cst_7 = arith.constant dense<0xFF800000> : vector<2x16xf32>
    %10 = vector.multi_reduction <maximumf>, %9, %cst_7 [2] : vector<2x16x32xf32> to vector<2x16xf32>
    %cst_8 = arith.constant 0.000000e+00 : f32
    %11 = vector.broadcast %cst_8 : f32 to vector<2x16xf32>
    %12 = arith.cmpf ogt, %10, %11 : vector<2x16xf32>
    %13 = tpu.iota {dimensions = array<i32: 1>} : vector<2x16xi32>
    %c16_i32 = arith.constant 16 : i32
    %14 = arith.muli %arg0, %c16_i32 : i32
    %15 = vector.broadcast %14 : i32 to vector<2x16xi32>
    %16 = arith.addi %15, %13 : vector<2x16xi32>
    %c40_i32 = arith.constant 40 : i32
    %17 = vector.broadcast %c40_i32 : i32 to vector<2x16xi32>
    %18 = arith.cmpi slt, %16, %17 : vector<2x16xi32>
    %cst_9 = arith.constant dense<true> : vector<2x16xi1>
    %19 = arith.xori %12, %cst_9 : vector<2x16xi1>
    %20 = arith.andi %19, %18 : vector<2x16xi1>
    %21 = arith.extui %20 : vector<2x16xi1> to vector<2x16xi32>
    %22 = arith.sitofp %21 : vector<2x16xi32> to vector<2x16xf32>
    %cst_10 = arith.constant dense<0xFF800000> : vector<2x16xf32>
    %23 = vector.multi_reduction <maximumf>, %4, %cst_10 [2] : vector<2x16x32xf32> to vector<2x16xf32>
    %24 = vector.shape_cast %23 : vector<2x16xf32> to vector<2x16x1xf32>
    %25 = vector.broadcast %24 : vector<2x16x1xf32> to vector<2x16x32xf32>
    %26 = arith.subf %4, %25 : vector<2x16x32xf32>
    %27 = math.exp %26 : vector<2x16x32xf32>
    %cst_11 = arith.constant dense<0.000000e+00> : vector<2x16xf32>
    %28 = vector.multi_reduction <add>, %27, %cst_11 [2] : vector<2x16x32xf32> to vector<2x16xf32>
    %29 = vector.shape_cast %28 : vector<2x16xf32> to vector<2x16x1xf32>
    %30 = math.log %29 : vector<2x16x1xf32>
    %31 = vector.broadcast %30 : vector<2x16x1xf32> to vector<2x16x32xf32>
    %32 = arith.subf %26, %31 : vector<2x16x32xf32>
    %cst_12 = arith.constant 0.000000e+00 : f32
    %33 = vector.broadcast %cst_12 : f32 to vector<2x16x32xf32>
    %34 = arith.select %6, %33, %5 : vector<2x16x32xi1>, vector<2x16x32xf32>
    %35 = arith.mulf %34, %32 : vector<2x16x32xf32>
    %cst_13 = arith.constant dense<0.000000e+00> : vector<2x16xf32>
    %36 = vector.multi_reduction <add>, %35, %cst_13 [2] : vector<2x16x32xf32> to vector<2x16xf32>
    %cst_14 = arith.constant 0.000000e+00 : f32
    %37 = vector.broadcast %cst_14 : f32 to vector<2x16xf32>
    %38 = arith.subf %37, %36 : vector<2x16xf32>
    %cst_15 = arith.constant 0.000000e+00 : f32
    %39 = vector.broadcast %cst_15 : f32 to vector<2x16xf32>
    %40 = arith.select %20, %38, %39 : vector<2x16xi1>, vector<2x16xf32>
    %c0_16 = arith.constant 0 : index
    %c0_17 = arith.constant 0 : index
    %41 = vector.load %arg6[%c0_16, %c0_17] : memref<2x1xf32, #tpu.memory_space<vmem>>, vector<2x1xf32>
    %cst_18 = arith.constant dense<0.000000e+00> : vector<2xf32>
    %42 = vector.multi_reduction <add>, %40, %cst_18 [1] : vector<2x16xf32> to vector<2xf32>
    %43 = vector.shape_cast %42 : vector<2xf32> to vector<2x1xf32>
    %44 = arith.addf %41, %43 : vector<2x1xf32>
    %c0_19 = arith.constant 0 : index
    %c0_20 = arith.constant 0 : index
    %45 = vector.load %arg6[%c0_19, %c0_20] : memref<2x1xf32, #tpu.memory_space<vmem>>, vector<2x1xf32>
    tpu.vector_store %arg6[%c0_19, %c0_20], %44 {strides = array<i32>} : memref<2x1xf32, #tpu.memory_space<vmem>>, vector<2x1xf32>,
    %c0_21 = arith.constant 0 : index
    %c0_22 = arith.constant 0 : index
    %46 = vector.load %arg7[%c0_21, %c0_22] : memref<2x1xf32, #tpu.memory_space<vmem>>, vector<2x1xf32>
    %cst_23 = arith.constant dense<0.000000e+00> : vector<2xf32>
    %47 = vector.multi_reduction <add>, %22, %cst_23 [1] : vector<2x16xf32> to vector<2xf32>
    %48 = vector.shape_cast %47 : vector<2xf32> to vector<2x1xf32>
    %49 = arith.addf %46, %48 : vector<2x1xf32>
    %c0_24 = arith.constant 0 : index
    %c0_25 = arith.constant 0 : index
    %50 = vector.load %arg7[%c0_24, %c0_25] : memref<2x1xf32, #tpu.memory_space<vmem>>, vector<2x1xf32>
    tpu.vector_store %arg7[%c0_24, %c0_25], %49 {strides = array<i32>} : memref<2x1xf32, #tpu.memory_space<vmem>>, vector<2x1xf32>,
    %c2_i32 = arith.constant 2 : i32
    %51 = arith.cmpi eq, %arg0, %c2_i32 : i32
    %52 = arith.extui %51 : i1 to i32
    %c0_i32_26 = arith.constant 0 : i32
    %53 = arith.cmpi ne, %52, %c0_i32_26 : i32
    scf.if %53 {
      %c0_27 = arith.constant 0 : index
      %c0_28 = arith.constant 0 : index
      %54 = vector.load %arg7[%c0_27, %c0_28] : memref<2x1xf32, #tpu.memory_space<vmem>>, vector<2x1xf32>
      %cst_29 = arith.constant 1.000000e+00 : f32
      %55 = vector.broadcast %cst_29 : f32 to vector<2x1xf32>
      %56 = arith.maximumf %54, %55 : vector<2x1xf32>
      %c0_30 = arith.constant 0 : index
      %c0_31 = arith.constant 0 : index
      %57 = vector.load %arg6[%c0_30, %c0_31] : memref<2x1xf32, #tpu.memory_space<vmem>>, vector<2x1xf32>
      %58 = arith.divf %57, %56 : vector<2x1xf32>
      %cst_32 = arith.constant 0.000000e+00 : f32
      %59 = vector.broadcast %cst_32 : f32 to vector<2x1xf32>
      %60 = arith.cmpf ogt, %54, %59 : vector<2x1xf32>
      %61 = arith.extui %60 : vector<2x1xi1> to vector<2x1xi32>
      %62 = arith.sitofp %61 : vector<2x1xi32> to vector<2x1xf32>
      %c0_33 = arith.constant 0 : index
      %c0_34 = arith.constant 0 : index
      %63 = vector.load %arg3[%c0_33, %c0_34] : memref<2x1xf32, #tpu.memory_space<vmem>>, vector<2x1xf32>
      %64 = arith.mulf %63, %62 : vector<2x1xf32>
      %65 = vector.shape_cast %64 : vector<2x1xf32> to vector<1x2x1xf32>
      %cst_35 = arith.constant dense<0.000000e+00> : vector<1xf32>
      %66 = vector.multi_reduction <add>, %65, %cst_35 [1, 2] : vector<1x2x1xf32> to vector<1xf32>
      %67 = vector.shape_cast %66 : vector<1xf32> to vector<1x1x1xf32>
      %68 = vector.extract %67[0, 0, 0] : f32 from vector<1x1x1xf32>
      %69 = vector.broadcast %68 : f32 to vector<1x1xf32>
      %cst_36 = arith.constant 9.99999993E-9 : f32
      %70 = vector.broadcast %cst_36 : f32 to vector<1x1xf32>
      %71 = arith.maximumf %69, %70 : vector<1x1xf32>
      %72 = arith.mulf %64, %58 : vector<2x1xf32>
      %c0_37 = arith.constant 0 : index
      %c0_38 = arith.constant 0 : index
      %73 = vector.load %arg5[%c0_37, %c0_38] : memref<2x1xf32, #tpu.memory_space<vmem>>, vector<2x1xf32>
      tpu.vector_store %arg5[%c0_37, %c0_38], %72 {strides = array<i32>} : memref<2x1xf32, #tpu.memory_space<vmem>>, vector<2x1xf32>,
      %74 = vector.shape_cast %72 : vector<2x1xf32> to vector<1x2x1xf32>
      %cst_39 = arith.constant dense<0.000000e+00> : vector<1xf32>
      %75 = vector.multi_reduction <add>, %74, %cst_39 [1, 2] : vector<1x2x1xf32> to vector<1xf32>
      %76 = vector.shape_cast %75 : vector<1xf32> to vector<1x1x1xf32>
      %77 = vector.extract %76[0, 0, 0] : f32 from vector<1x1x1xf32>
      %78 = vector.broadcast %77 : f32 to vector<1x1xf32>
      %79 = arith.divf %78, %71 : vector<1x1xf32>
      %c0_40 = arith.constant 0 : index
      %c0_41 = arith.constant 0 : index
      %80 = vector.load %arg4[%c0_40, %c0_41] : memref<1x1xf32, #tpu.memory_space<vmem>>, vector<1x1xf32>
      tpu.vector_store %arg4[%c0_40, %c0_41], %79 {strides = array<i32>} : memref<1x1xf32, #tpu.memory_space<vmem>>, vector<1x1xf32>,
    } else {
    }
    return
  }
  func.func @transform_0(%arg0: i32) -> (i32, i32, i32) {
    %c0_i32 = arith.constant 0 : i32
    %c0_i32_0 = arith.constant 0 : i32
    %c0_i32_1 = arith.constant 0 : i32
    return %c0_i32, %arg0, %c0_i32_0 : i32, i32, i32
  }
  func.func @transform_1(%arg0: i32) -> (i32, i32, i32) {
    %c0_i32 = arith.constant 0 : i32
    %c0_i32_0 = arith.constant 0 : i32
    %c0_i32_1 = arith.constant 0 : i32
    return %c0_i32, %arg0, %c0_i32_0 : i32, i32, i32
  }
  func.func @transform_2(%arg0: i32) -> (i32, i32) {
    %c0_i32 = arith.constant 0 : i32
    %c0_i32_0 = arith.constant 0 : i32
    %c0_i32_1 = arith.constant 0 : i32
    return %c0_i32, %c0_i32_0 : i32, i32
  }
  func.func @transform_3(%arg0: i32) -> (i32, i32) {
    %c0_i32 = arith.constant 0 : i32
    %c0_i32_0 = arith.constant 0 : i32
    %c0_i32_1 = arith.constant 0 : i32
    return %c0_i32, %c0_i32_0 : i32, i32
  }
  func.func @transform_4(%arg0: i32) -> (i32, i32) {
    %c0_i32 = arith.constant 0 : i32
    %c0_i32_0 = arith.constant 0 : i32
    %c0_i32_1 = arith.constant 0 : i32
    return %c0_i32, %c0_i32_0 : i32, i32
  }
}

</mosaic_0001>

<bundles_post_ra>
// kernel: tpu_custom_call.1
= control target key start
LH: loop header
LB: loop body
LE: loop exit
PB: predicated region body
PF: predicated region fallthrough
CT: control target
= control target key end

     0   :  { %10 = vsyncpa [#allocation7], 0  ;;  %s1445_s15 = smov 0   ;;  %s1447_s16 = smov 0   ;;  %s1706_s0 = inlined_call_operand.vmem [shape: bf16[2,40,32], index: 0, kind: input, shape index: {}]   ;;  %s1707_s1 = inlined_call_operand.vmem [shape: f32[2,40,32], index: 1, kind: input, shape index: {}]   ;;  %s1708_s2 = inlined_call_operand.vmem [shape: f32[2,1], index: 2, kind: input, shape index: {}]   ;;  %s1709_s3 = inlined_call_operand.hbm [shape: f32[1,1], index: 3, kind: output, shape index: {0}]   ;;  %s1710_s4 = inlined_call_operand.vmem [shape: f32[2,1], index: 4, kind: output, shape index: {1}]  }
   0x1   :  { %s1449_s17 = smov 0  }
   0x2 LB: > { %s1461_s18 = sadd.s32 4294967295, %s1348_s17   ;;  %s1464_s19 = sadd.s32 1, %s1348_s17   ;;  %s1348_s17 = sphi %s1449_s17, %s1724_s17   ;;  %s1344_s16 = sphi %s1447_s16, %s1723_s16   ;;  %s1340_s15 = sphi %s1445_s15, %s1722_s15  }
   0x3   : > { %s20_s20 = ssub.s32 %s1348_s17, %s1464_s19  ;;  %s23_s21 = sadd.s32 1, %s1344_s16 }
   0x4   : > { %p21_p0 = scmp.eq.s32.totalorder %s20_s20, 0  ;;  %p30_p1 = scmp.ne.s32.totalorder %s1344_s16, %s1340_s15 }
   0x5   : > { %p31_p2 = scmp.eq.s32.totalorder %s1348_s17, 0  ;;  %p971_p4 = scmp.ge.s32.totalorder %s1348_s17, 3 }
   0x6   : > { %s1473_s22 = scalar_select %p21_p0, %s1344_s16, %s23_s21  }
   0x7   : > { %p1475_p3 = por %p31_p2, %p30_p1  ;;  %148 = sbr.rel (%p971_p4) target bundleno = 130 (0x82), region = 20 }
   0xe   : > { %151 = sbr.rel (!%p1475_p3) target bundleno = 74 (0x4a), region = 24  ;;  %s153_s24 = sand.u32 (%p1475_p3), 1, %s1344_s16  }
   0xf   : > { %s973_s25 = sshll.u32 (%p1475_p3), %s1348_s17, 1  ;;  %s972_s26 = sshll.u32 (%p1475_p3), %s153_s24, 4 }
  0x10   : > { %s157_s27 = ssub.s32 (%p1475_p3), 5, %s973_s25  ;;  %s1017_s28 = sshll.u32 (%p1475_p3), %s1348_s17, 3 }
  0x11   : > { %p158_p5 = scmp.lt.s32.totalorder (%p1475_p3), %s157_s27, 2  ;;  %s1490_s5 = scalar_lea.vmem (%p1475_p3), %s1706_s0, %s1017_s28  }
  0x12   : > { %s1493_s7 = scalar_lea.vmem (%p1475_p3), [#allocation4], %s972_s26  }
  0x15   : > { %s1726_s27 = smov (!%p158_p5, %s157_s27), 2 }
  0x16   : > { %s974_s6 = sshll.u32 %s1726_s27, 7 }
  0x17   : > { %p977_p6 = scmp.eq.s32.totalorder %s974_s6, 0 }
  0x18   : > { %s1496_s8 = sshrl.u32 (!%p977_p6), %s1726_s27, 1 }
  0x19   : > { %166 = sbr.rel (%p977_p6) target bundleno = 74 (0x4a), region = 28  ;;  %p978_p7 = scmp.le.s32.totalorder (!%p977_p6), %s1496_s8, 0 }
  0x20   : > { %895 = sbr.rel (%p978_p7) target bundleno = 53 (0x35), region = 218  ;;  %s1712_s9 = smov (!%p978_p7), %s1493_s7 }
  0x21   : > { %s1713_s10 = smov (!%p978_p7), %s1490_s5  ;;  %s1505_s11 = smov (!%p978_p7), 0  }
  0x22   : > { %s1362_s12 = smov (!%p978_p7), 0  }
  0x27 LB: >> { %v182_v0 = vld [vmem:[%s1356_s10] sm:$0xf]  ;;  %v184_v1 = vld [vmem:[%s1356_s10 + $0x4] sm:$0xf]  ;;  %v186_v2 = vld [vmem:[%s1356_s10 + $0x14] sm:$0xf]  ;;  %s1364_s12 = sphi %s1362_s12, %s176_s12   ;;  %s1360_s11 = sphi %s1505_s11, %s1714_s11   ;;  %s1356_s10 = sphi %s1713_s10, %s195_s10   ;;  %s1352_s9 = sphi %s1712_s9, %s196_s9  }
  0x28   : >> { %183 = vst [vmem:[%s1352_s9] sm:$0xf] %v182_v0  ;;  %185 = vst [vmem:[%s1352_s9 + $0x4] sm:$0xf] %v184_v1  ;;  %v188_v3 = vld [vmem:[%s1356_s10 + $0x18] sm:$0xf]  ;;  %s190_s13 = sadd.s32 1, %s1360_s11 }
  0x29   : >> { %187 = vst [vmem:[%s1352_s9 + $0x8] sm:$0xf] %v186_v2  ;;  %189 = vst [vmem:[%s1352_s9 + $0xc] sm:$0xf] %v188_v3  ;;  %p191_p8 = scmp.ge.s32.totalorder %s190_s13, %s1496_s8  ;;  %s176_s12 = sadd.s32 1, %s1364_s12  }
  0x2a   : >> { %p175_p9 = scmp.ge.s32.totalorder %s176_s12, %s1496_s8 }
  0x2b   : >> { %s1728_s13 = smov (%p191_p8, %s190_s13), 0 }
  0x2c   : >> { %s979_s14 = sshll.u32 %s1728_s13, 3  ;;  %s1714_s11 = smov %s1728_s13 }
  0x2d   : >> { %s195_s10 = scalar_lea.vmem %s1490_s5, %s979_s14   ;;  %s196_s9 = scalar_lea.vmem %s1493_s7, %s979_s14 [#allocation4]  }
  0x2e   : > { %178 = sbr.rel (!%p175_p9) target bundleno = 39 (0x27), region = 224 }
  0x35 PF: > { %s1521_s20 = sand.u32 1, %s1726_s27   ;;  %s1018_s21 = sshll.u32 %s1496_s8, 3 }
  0x36   : > { %s1525_s24 = scalar_lea.vmem %s1490_s5, %s1018_s21   ;;  %s203_s25 = scalar_lea.vmem %s1493_s7, %s1018_s21 [#allocation4]  }
  0x37   : > { %p984_p10 = scmp.le.s32.totalorder %s1521_s20, 0 }
  0x38   : > { %s1366_s26 = smov (!%p984_p10), %s203_s25   ;;  %s1370_s28 = smov (!%p984_p10), %s1525_s24  }
  0x39   : > { %909 = sbr.rel (%p984_p10) target bundleno = 74 (0x4a), region = 229  ;;  %s1374_s29 = smov (!%p984_p10), 0  }
  0x3a   : > { %s1378_s30 = smov (!%p984_p10), 0  }
  0x40 LB: >> { %v213_v4 = vld [vmem:[%s1372_s28] sm:$0xf]  ;;  %v215_v5 = vld [vmem:[%s1372_s28 + $0x14] sm:$0xf]  ;;  %s217_s27 = sadd.s32 1, %s1376_s29  ;;  %s207_s30 = sadd.s32 1, %s1380_s30   ;;  %s1380_s30 = sphi %s1378_s30, %s207_s30   ;;  %s1376_s29 = sphi %s1374_s29, %s1375_s29   ;;  %s1372_s28 = sphi %s1370_s28, %s222_s28   ;;  %s1368_s26 = sphi %s1366_s26, %s223_s26  }
  0x41   : >> { %214 = vst [vmem:[%s1368_s26] sm:$0xf] %v213_v4  ;;  %216 = vst [vmem:[%s1368_s26 + $0x8] sm:$0xf] %v215_v5  ;;  %p218_p11 = scmp.ge.s32.totalorder %s217_s27, %s1521_s20  ;;  %p206_p12 = scmp.ge.s32.totalorder %s207_s30, %s1521_s20 }
  0x43   : >> { %s1730_s27 = smov (%p218_p11, %s217_s27), 0  ;;  %209 = sbr.rel (!%p206_p12) target bundleno = 64 (0x40), region = 235 }
  0x44   : >> { %s985_s5 = sshll.u32 %s1730_s27, 2  ;;  %s1375_s29 = smov %s1730_s27  }
  0x45   : >> { %s222_s28 = scalar_lea.vmem %s1525_s24, %s985_s5   ;;  %s223_s26 = scalar_lea.vmem %s203_s25, %s985_s5 [#allocation4]  }
  0x4a PF: > { %322 = sbr.rel (!%p1475_p3) target bundleno = 130 (0x82), region = 86  ;;  %s324_s6 = sand.u32 (%p1475_p3), 1, %s1344_s16  }
  0x4b   : > { %s988_s7 = sshll.u32 (%p1475_p3), %s1348_s17, 1  ;;  %s987_s8 = sshll.u32 (%p1475_p3), %s324_s6, 5 }
  0x4c   : > { %s328_s9 = ssub.s32 (%p1475_p3), 5, %s988_s7  ;;  %s1020_s10 = sshll.u32 (%p1475_p3), %s1348_s17, 4 }
  0x4d   : > { %p329_p13 = scmp.lt.s32.totalorder (%p1475_p3), %s328_s9, 2  ;;  %s1543_s13 = scalar_lea.vmem (%p1475_p3), %s1707_s1, %s1020_s10  }
  0x4e   : > { %s1546_s23 = scalar_lea.vmem (%p1475_p3), [#allocation5], %s987_s8  }
  0x51   : > { %s1732_s9 = smov (!%p329_p13, %s328_s9), 2 }
  0x52   : > { %s989_s14 = sshll.u32 %s1732_s9, 8 }
  0x53   : > { %p992_p0 = scmp.eq.s32.totalorder %s989_s14, 0 }
  0x54   : > { %s1549_s20 = sshrl.u32 (!%p992_p0), %s1732_s9, 1 }
  0x55   : > { %337 = sbr.rel (%p992_p0) target bundleno = 130 (0x82), region = 90  ;;  %p993_p1 = scmp.le.s32.totalorder (!%p992_p0), %s1549_s20, 0 }
  0x5c   : > { %923 = sbr.rel (%p993_p1) target bundleno = 109 (0x6d), region = 240  ;;  %s1715_s21 = smov (!%p993_p1), %s1546_s23 }
  0x5d   : > { %s1716_s24 = smov (!%p993_p1), %s1543_s13  ;;  %s1558_s25 = smov (!%p993_p1), 0  }
  0x5e   : > { %s1394_s26 = smov (!%p993_p1), 0  }
  0x63 LB: >> { %v407_v6 = vld [vmem:[%s1388_s24] sm:$0xff]  ;;  %v409_v7 = vld [vmem:[%s1388_s24 + $0x8] sm:$0xff]  ;;  %s415_s28 = sadd.s32 1, %s1392_s25  ;;  %v413_v9 = vld [vmem:[%s1388_s24 + $0x30] sm:$0xff]  ;;  %s401_s26 = sadd.s32 1, %s1396_s26   ;;  %s1396_s26 = sphi %s1394_s26, %s401_s26   ;;  %s1392_s25 = sphi %s1558_s25, %s1717_s25   ;;  %s1388_s24 = sphi %s1716_s24, %s420_s24   ;;  %s1384_s21 = sphi %s1715_s21, %s421_s21  }
  0x64   : >> { %v411_v8 = vld [vmem:[%s1388_s24 + $0x28] sm:$0xff]  ;;  %408 = vst [vmem:[%s1384_s21] sm:$0xff] %v407_v6  ;;  %410 = vst [vmem:[%s1384_s21 + $0x8] sm:$0xff] %v409_v7  ;;  %p416_p2 = scmp.ge.s32.totalorder %s415_s28, %s1549_s20  ;;  %p400_p3 = scmp.ge.s32.totalorder %s401_s26, %s1549_s20 }
  0x65   : >> { %412 = vst [vmem:[%s1384_s21 + $0x10] sm:$0xff] %v411_v8  ;;  %414 = vst [vmem:[%s1384_s21 + $0x18] sm:$0xff] %v413_v9 }
  0x66   : >> { %s1734_s28 = smov (%p416_p2, %s415_s28), 0  ;;  %403 = sbr.rel (!%p400_p3) target bundleno = 99 (0x63), region = 246 }
  0x67   : >> { %s994_s29 = sshll.u32 %s1734_s28, 4  ;;  %s1717_s25 = smov %s1734_s28 }
  0x68   : >> { %s420_s24 = scalar_lea.vmem %s1543_s13, %s994_s29   ;;  %s421_s21 = scalar_lea.vmem %s1546_s23, %s994_s29 [#allocation5]  }
  0x6d PF: > { %s1574_s30 = sand.u32 1, %s1732_s9   ;;  %s1021_s27 = sshll.u32 %s1549_s20, 4 }
  0x6e   : > { %s1578_s5 = scalar_lea.vmem %s1543_s13, %s1021_s27   ;;  %s428_s6 = scalar_lea.vmem %s1546_s23, %s1021_s27 [#allocation5]  }
  0x6f   : > { %p999_p4 = scmp.le.s32.totalorder %s1574_s30, 0 }
  0x70   : > { %s1398_s7 = smov (!%p999_p4), %s428_s6   ;;  %s1402_s8 = smov (!%p999_p4), %s1578_s5  }
  0x71   : > { %937 = sbr.rel (%p999_p4) target bundleno = 130 (0x82), region = 251  ;;  %s1406_s10 = smov (!%p999_p4), 0  }
  0x72   : > { %s1410_s11 = smov (!%p999_p4), 0  }
  0x78 LB: >> { %v438_v10 = vld [vmem:[%s1404_s8] sm:$0xff]  ;;  %v440_v11 = vld [vmem:[%s1404_s8 + $0x28] sm:$0xff]  ;;  %s442_s9 = sadd.s32 1, %s1408_s10  ;;  %s432_s11 = sadd.s32 1, %s1412_s11   ;;  %s1412_s11 = sphi %s1410_s11, %s432_s11   ;;  %s1408_s10 = sphi %s1406_s10, %s1407_s10   ;;  %s1404_s8 = sphi %s1402_s8, %s447_s8   ;;  %s1400_s7 = sphi %s1398_s7, %s448_s7  }
  0x79   : >> { %439 = vst [vmem:[%s1400_s7] sm:$0xff] %v438_v10  ;;  %441 = vst [vmem:[%s1400_s7 + $0x10] sm:$0xff] %v440_v11  ;;  %p443_p5 = scmp.ge.s32.totalorder %s442_s9, %s1574_s30  ;;  %p431_p6 = scmp.ge.s32.totalorder %s432_s11, %s1574_s30 }
  0x7b   : >> { %s1736_s9 = smov (%p443_p5, %s442_s9), 0  ;;  %434 = sbr.rel (!%p431_p6) target bundleno = 120 (0x78), region = 257 }
  0x7c   : >> { %s1000_s12 = sshll.u32 %s1736_s9, 3  ;;  %s1407_s10 = smov %s1736_s9  }
  0x7d   : >> { %s447_s8 = scalar_lea.vmem %s1578_s5, %s1000_s12   ;;  %s448_s7 = scalar_lea.vmem %s428_s6, %s1000_s12 [#allocation5]  }
  0x82 PF: > { %p1002_p7 = scmp.ge.s32.totalorder %s1348_s17, 1  ;;  %p453_p8 = scmp.lt.s32.totalorder %s1348_s17, 4 }
  0x84   : > { %p454_p9 = pnand %p1002_p7, %p453_p8 }
  0x85   : > { %s460_s13 = sand.u32 (!%p454_p9), 1, %s1340_s15   ;;  %p1005_p10 = scmp.ne.s32.totalorder (!%p454_p9), %s1461_s18, 0 }
  0x86   : > { %457 = sbr.rel (%p454_p9) target bundleno = 1174 (0x496), region = 138  ;;  %s1003_s14 = sshll.u32 (!%p454_p9), %s460_s13, 4 }
  0x87   : > { %s1004_s23 = sshll.u32 (!%p454_p9), %s460_s13, 5  ;;  %s462_s20 = scalar_lea.vmem (!%p454_p9), [#allocation4], %s1003_s14 }
  0x88   : > { %s1589_s21 = scalar_lea.vmem (!%p454_p9), [#allocation5], %s1004_s23 }
  0x8d   : > { %504 = sbr.rel (%p1005_p10) target bundleno = 148 (0x94), region = 150  ;;  %vm505_vm0 = vcmask (!%p1005_p10), 1024   ;;  %v1414_v12 = vmov (!%p1005_p10), 0.0  }
  0x8e   : > { %506 = vst.msk [vmem:[#allocation2] sm:$0x3] (!%p1005_p10), %vm505_vm0, %v1414_v12  ;;  %507 = vst.msk [vmem:[#allocation3] sm:$0x3] (!%p1005_p10), %vm505_vm0, %v1414_v12 }
  0x94 PF: > { %v1024_v13 = vld [vmem:[%s462_s20] sm:$0xff]   ;;  %vm528_vm1 = vcmask 261120   ;;  %v1031_v14 = vld [vmem:[%s462_s20 + $0x8] sm:$0xff]   ;;  %v1415_v44 = vmov 0.0   ;;  %v1416_v60 = vmov 0   ;;  %s1006_s15 = sshll.u32 %s1461_s18, 4 }
  0x95   : > { %v1025_v15 = vunpack.c.l.bf16 %v1024_v13  ;;  %v1029_v16 = vunpack.c.l.bf16 %v1031_v14  ;;  %v1026_v17 = vunpack.c.h.bf16 %v1024_v13  ;;  %v1030_v18 = vunpack.c.h.bf16 %v1031_v14  ;;  %v516_v43 = vld [vmem:[%s1589_s21] sm:$0xff]  ;;  %v518_v47 = vld [vmem:[%s1589_s21 + $0x10] sm:$0xff]  ;;  %v517_v48 = vld [vmem:[%s1589_s21 + $0x8] sm:$0xff]  ;;  %1201 = vset.pattern.permute.xlu0 %v1416_v60  ;;  %1200 = vset.pattern.permute.xlu1 %v1416_v60  ;;  %p1011_p11 = scmp.ne.s32.totalorder %s1461_s18, 2 }
  0x96   : > { %vm520_vm2 = vcmp.ne.f32.partialorder %v516_v43, %v516_v43  ;;  %vm522_vm3 = vcmp.ne.f32.partialorder %v518_v47, %v518_v47  ;;  %vm521_vm4 = vcmp.ne.f32.partialorder %v517_v48, %v517_v48  ;;  %v519_v53 = vld [vmem:[%s1589_s21 + $0x18] sm:$0xff]  ;;  %vm1417_vm10 = vmmov 1  }
  0x97   : > { %v577_v19 = vsel %vm528_vm1, %v1025_v15, -inf  ;;  %v583_v20 = vsel %vm528_vm1, %v1029_v16, -inf  ;;  %v580_v21 = vsel %vm528_vm1, %v1026_v17, -inf  ;;  %v586_v22 = vsel %vm528_vm1, %v1030_v18, -inf }
  0x98   : > { %578 = vmax.xlane.f32.xlu0 %v577_v19  ;;  %584 = vmax.xlane.f32.xlu1 %v583_v20  ;;  %v524_v45 = vsel %vm520_vm2, 1.0, %v1415_v44  ;;  %v526_v49 = vsel %vm522_vm3, 1.0, %v1415_v44  ;;  %v525_v50 = vsel %vm521_vm4, 1.0, %v1415_v44  ;;  %v625_v54 = vsel %vm520_vm2, 0.0, %v516_v43 }
  0x99   : > { %v529_v46 = vsel %vm528_vm1, %v524_v45, -inf  ;;  %v535_v51 = vsel %vm528_vm1, %v526_v49, -inf  ;;  %v532_v52 = vsel %vm528_vm1, %v525_v50, -inf  ;;  %vm523_vm5 = vcmp.ne.f32.partialorder %v519_v53, %v519_v53 }
  0x9a   : > { %v527_v55 = vsel %vm523_vm5, 1.0, %v1415_v44  ;;  %v626_v57 = vsel %vm521_vm4, 0.0, %v517_v48  ;;  %v627_v58 = vsel %vm522_vm3, 0.0, %v518_v47  ;;  %v628_v59 = vsel %vm523_vm5, 0.0, %v519_v53 }
  0x9b   : > { %v538_v56 = vsel %vm528_vm1, %v527_v55, -inf }
  0x9c   : > { %581 = vmax.xlane.f32.xlu0 %v580_v21  ;;  %587 = vmax.xlane.f32.xlu1 %v586_v22  ;;  %v545_v21 = vlaneseq }
  0x9e   : > { %v546_v22 = vand.u32 127, %v545_v21  ;;  %v671_v55 = vshrl.u32 %v545_v21, 7  ;;  %v700_v21 = vld [vmem:[#allocation3] sm:$0x3] }
  0xa0   : > { %v674_v53 = vadd.s32 4294967288, %v546_v22 }
 0x125   : > { %v579_v23 = vpop.xlane.xlu0 %578  ;;  %v585_v24 = vpop.xlane.xlu1 %584 }
 0x126   : > { %v1596_v25 = vsub.f32 %v1025_v15, %v579_v23  ;;  %v1598_v26 = vsub.f32 %v1029_v16, %v585_v24  ;;  %v548_v23 = vstv %s1006_s15 }
 0x127   : > { %v549_v24 = vadd.s32 %v548_v23, %v546_v22 }
 0x128   : > { %v593_v27 = vmul.f32 1.442695, %v1596_v25  ;;  %v597_v28 = vmul.f32 1.442695, %v1598_v26 }
 0x129   : > { %v582_v29 = vpop.xlane.xlu0 %581  ;;  %v588_v30 = vpop.xlane.xlu1 %587  ;;  %vm550_vm6 = vcmp.lt.s32.totalorder %v549_v24, 40 }
 0x12a   : > { %1212 = vpow2.f32 %v593_v27  ;;  %v1602_v31 = vsub.f32 %v1026_v17, %v582_v29  ;;  %v1604_v32 = vsub.f32 %v1030_v18, %v588_v30 }
 0x12b   : > { %1214 = vpow2.f32 %v597_v28 }
 0x12c   : > { %v595_v33 = vmul.f32 1.442695, %v1602_v31  ;;  %v599_v34 = vmul.f32 1.442695, %v1604_v32 }
 0x12e   : > { %1216 = vpow2.f32 %v595_v33 }
 0x12f   : > { %1218 = vpow2.f32 %v599_v34 }
 0x134   : > { %v1213_v35 = vpop.eup %1212 }
 0x135   : > { %v1215_v36 = vpop.eup %1214  ;;  %v601_v37 = vsel %vm528_vm1, %v1213_v35, 0.0 }
 0x136   : > { %602 = vadd.xlane.f32.xlu0 %v601_v37  ;;  %v607_v38 = vsel %vm528_vm1, %v1215_v36, 0.0 }
 0x138   : > { %v1217_v39 = vpop.eup %1216 }
 0x139   : > { %v1219_v40 = vpop.eup %1218  ;;  %v604_v41 = vsel %vm528_vm1, %v1217_v39, 0.0 }
 0x13a   : > { %608 = vadd.xlane.f32.xlu0 %v607_v38  ;;  %605 = vadd.xlane.f32.xlu1 %v604_v41  ;;  %v610_v42 = vsel %vm528_vm1, %v1219_v40, 0.0 }
 0x13e   : > { %611 = vadd.xlane.f32.xlu1 %v610_v42  ;;  %530 = vmax.xlane.f32.xlu0 %v529_v46 }
 0x142   : > { %536 = vmax.xlane.f32.xlu0 %v535_v51  ;;  %533 = vmax.xlane.f32.xlu1 %v532_v52 }
 0x146   : > { %539 = vmax.xlane.f32.xlu1 %v538_v56 }
 0x1c3   : > { %v603_v61 = vpop.xlane.xlu0 %602 }
 0x1c4   : > { %1220 = vlog2.f32 %v603_v61 }
 0x1c7   : > { %v606_v62 = vpop.xlane.xlu1 %605  ;;  %v609_v63 = vpop.xlane.xlu0 %608 }
 0x1c8   : > { %1222 = vlog2.f32 %v606_v62 }
 0x1c9   : > { %1224 = vlog2.f32 %v609_v63 }
 0x1cb   : > { %v612_v0 = vpop.xlane.xlu1 %611 }
 0x1cc   : > { %1226 = vlog2.f32 %v612_v0 }
 0x1ce   : > { %v1221_v1 = vpop.eup %1220 }
 0x1cf   : > { %v614_v2 = vmul.f32 0.6931472, %v1221_v1  ;;  %v534_v27 = vpop.xlane.xlu1 %533 }
 0x1d0   : > { %vm542_vm8 = vcmp.gt.f32.partialorder %v534_v27, 0.0  ;;  %v1418_v27 = vmov (!%p1011_p11), 0.0  }
 0x1d1   : > { %v621_v3 = vsub.f32 %v1596_v25, %v614_v2  ;;  %v555_v25 = vsel %vm550_vm6, 1, %v1416_v60  ;;  %vm1635_vm12 = vmxor %vm542_vm8, %vm1417_vm10  ;;  %vm679_vm6 = vcmask 130112   ;;  %vm693_vm8 = vcmask 123904  }
 0x1d2   : > { %v1223_v4 = vpop.eup %1222 }
 0x1d3   : > { %v1225_v5 = vpop.eup %1224  ;;  %v616_v6 = vmul.f32 0.6931472, %v1223_v4  ;;  %v629_v7 = vmul.f32 %v625_v54, %v621_v3  ;;  %v540_v29 = vpop.xlane.xlu1 %539 }
 0x1d4   : > { %v618_v8 = vmul.f32 0.6931472, %v1225_v5  ;;  %vm544_vm14 = vcmp.gt.f32.partialorder %v540_v29, 0.0 }
 0x1d5   : > { %v633_v9 = vsel %vm528_vm1, %v629_v7, 0.0  ;;  %v622_v10 = vsub.f32 %v1602_v31, %v616_v6  ;;  %vm554_vm2 = vmxor %vm544_vm14, %vm1417_vm10 }
 0x1d6   : > { %v1227_v11 = vpop.eup %1226  ;;  %634 = vadd.xlane.f32.xlu0 %v633_v9  ;;  %v623_v12 = vsub.f32 %v1598_v26, %v618_v8  ;;  %v531_v26 = vpop.xlane.xlu0 %530 }
 0x1d7   : > { %v620_v13 = vmul.f32 0.6931472, %v1227_v11  ;;  %v630_v14 = vmul.f32 %v626_v57, %v622_v10  ;;  %vm541_vm7 = vcmp.gt.f32.partialorder %v531_v26, 0.0  ;;  %v677_v57 = vsub.s32 %v674_v53, %v671_v55 }
 0x1d8   : > { %v631_v15 = vmul.f32 %v627_v58, %v623_v12  ;;  %vm551_vm11 = vmxor %vm541_vm7, %vm1417_vm10  ;;  %vm690_vm7 = vcmask 1041409  }
 0x1d9   : > { %v636_v16 = vsel %vm528_vm1, %v630_v14, 0.0  ;;  %v624_v17 = vsub.f32 %v1604_v32, %v620_v13 }
 0x1da   : > { %637 = vadd.xlane.f32.xlu1 %v636_v16  ;;  %v639_v18 = vsel %vm528_vm1, %v631_v15, 0.0  ;;  %v537_v28 = vpop.xlane.xlu0 %536 }
 0x1db   : > { %640 = vadd.xlane.f32.xlu0 %v639_v18  ;;  %v632_v19 = vmul.f32 %v628_v59, %v624_v17  ;;  %vm543_vm9 = vcmp.gt.f32.partialorder %v537_v28, 0.0  ;;  %v672_v59 = vsub.s32 %v546_v22, %v671_v55  ;;  %v653_v18 = vld [vmem:[#allocation2] sm:$0x3] }
 0x1dc   : > { %vm553_vm13 = vmxor %vm543_vm9, %vm1417_vm10  ;;  %vm698_vm9 = vcmask 1024  }
 0x1dd   : > { %v642_v20 = vsel %vm528_vm1, %v632_v19, 0.0 }
 0x1de   : > { %643 = vadd.xlane.f32.xlu1 %v642_v20 }
 0x1ef   : > { %561 = vbcast.lane.b32.xlu1 %v555_v25, 264 }
 0x1f1   : > { %557 = vbcast.lane.b32.xlu0 %v555_v25, 256  ;;  %v754_v25 = vld [vmem:[%s1708_s2] sm:$0x3] (!%p1011_p11) }
 0x263   : > { %v635_v30 = vpop.xlane.xlu0 %634 }
 0x264   : > { %v645_v36 = vsub.f32 0.0, %v635_v30 }
 0x267   : > { %v638_v31 = vpop.xlane.xlu1 %637 }
 0x268   : > { %v641_v32 = vpop.xlane.xlu0 %640  ;;  %v646_v41 = vsub.f32 0.0, %v638_v31 }
 0x269   : > { %v647_v37 = vsub.f32 0.0, %v641_v32 }
 0x26b   : > { %v644_v33 = vpop.xlane.xlu1 %643 }
 0x26c   : > { %v558_v35 = vpop.permute.xlu0 %557  ;;  %v648_v48 = vsub.f32 0.0, %v644_v33 }
 0x26d   : > { %vm563_vm15 = vcmp.ne.s32.totalorder %v558_v35, 0 }
 0x26e   : > { %vm1639_vm0 = vmand %vm551_vm11, %vm563_vm15  ;;  %vm783_vm11 = vcmask (!%p1011_p11), 0  }
 0x26f   : > { %vm567_vm1 = vmand %vm553_vm13, %vm563_vm15  ;;  %v562_v39 = vpop.permute.xlu1 %561  ;;  %v649_v40 = vsel %vm1639_vm0, %v645_v36, 0.0  ;;  %v1007_v51 = vsel %vm1639_vm0, 1.0, %v1415_v44 }
 0x270   : > { %vm564_vm3 = vcmp.ne.s32.totalorder %v562_v39, 0  ;;  %v651_v42 = vsel %vm567_vm1, %v647_v37, 0.0  ;;  %659 = vperm.xlu1 %1200, %v649_v40   ;;  %v1009_v45 = vsel %vm567_vm1, 1.0, %v1415_v44 }
 0x271   : > { %vm566_vm4 = vmand %vm1635_vm12, %vm564_vm3  ;;  %665 = vperm.xlu0 %1201, %v651_v42  }
 0x272   : > { %vm568_vm5 = vmand %vm554_vm2, %vm564_vm3  ;;  %v650_v43 = vsel %vm566_vm4, %v646_v41, 0.0  ;;  %v1008_v49 = vsel %vm566_vm4, 1.0, %v1415_v44 }
 0x273   : > { %v1010_v46 = vsel %vm568_vm5, 1.0, %v1415_v44  ;;  %v652_v50 = vsel %vm568_vm5, %v648_v48, 0.0  ;;  %v1202_v52 = vpack.i.bf16 %v1008_v49, %v1007_v51 }
 0x274   : > { %v1207_v47 = vpack.i.bf16 %v1010_v46, %v1009_v45  ;;  %662 = vperm.xlu1 %1200, %v650_v43  }
 0x276   : > { %1208 = vperm.xlu0 %1201, %v1207_v47  }
 0x278   : > { %668 = vperm.xlu1 %1200, %v652_v50  }
 0x27c   : > { %1203 = vperm.xlu1 %1200, %v1202_v52  }
 0x2ef   : > { %v660_v54 = vpop.permute.xlu1 %659 }
 0x2f0   : > { %v666_v56 = vpop.permute.xlu0 %665  ;;  %v673_v1 = vrot.slane %v660_v54, %v672_v59 }
 0x2f1   : > { %v684_v0 = vrot.slane %v666_v56, %v672_v59 }
 0x2f3   : > { %v663_v58 = vpop.permute.xlu1 %662 }
 0x2f4   : > { %v678_v61 = vrot.slane %v663_v58, %v677_v57 }
 0x2f5   : > { %v1209_v60 = vpop.permute.xlu0 %1208 }
 0x2f6   : > { %v1211_v62 = vunpack.i.h.bf16 %v1209_v60  ;;  %v1210_v2 = vunpack.i.l.bf16 %v1209_v60  ;;  %v680_v44 = vsel %vm679_vm6, %v678_v61, %v673_v1 }
 0x2f7   : > { %v669_v63 = vpop.permute.xlu1 %668 }
 0x2f8   : > { %v688_v3 = vrot.slane %v669_v63, %v677_v57  ;;  %v733_v5 = vrot.slane %v1211_v62, %v677_v57  ;;  %v729_v8 = vrot.slane %v1210_v2, %v672_v59 }
 0x2fa   : > { %v689_v4 = vsel %vm679_vm6, %v688_v3, %v684_v0  ;;  %v734_v15 = vsel %vm679_vm6, %v733_v5, %v729_v8 }
 0x2fb   : > { %v1204_v6 = vpop.permute.xlu1 %1203  ;;  %v691_v7 = vsel %vm690_vm7, %v689_v4, %v680_v44 }
 0x2fc   : > { %v1206_v9 = vunpack.i.h.bf16 %v1204_v6  ;;  %v1205_v10 = vunpack.i.l.bf16 %v1204_v6  ;;  %v694_v11 = vsel %vm693_vm8, %v691_v7, 0.0 }
 0x2fd   : > { %695 = vadd.xlane.f32.xlu1 %v694_v11 }
 0x2fe   : > { %v724_v12 = vrot.slane %v1206_v9, %v677_v57  ;;  %v720_v13 = vrot.slane %v1205_v10, %v672_v59 }
 0x300   : > { %v725_v14 = vsel %vm679_vm6, %v724_v12, %v720_v13 }
 0x301   : > { %v735_v16 = vsel %vm690_vm7, %v734_v15, %v725_v14 }
 0x302   : > { %v737_v17 = vsel %vm693_vm8, %v735_v16, 0.0 }
 0x303   : > { %738 = vadd.xlane.f32.xlu0 %v737_v17 }
 0x38a   : > { %v696_v19 = vpop.xlane.xlu1 %695 }
 0x38b   : > { %v697_v20 = vadd.f32 %v696_v19, %v653_v18 }
 0x38d   : > { %699 = vst.msk [vmem:[#allocation2] sm:$0x3] %vm698_vm9, %v697_v20  ;;  %745 = sbr.rel (%p1011_p11) target bundleno = 1149 (0x47d), region = 154 }
 0x390   : > { %v739_v22 = vpop.xlane.xlu0 %738 }
 0x391   : > { %v740_v23 = vadd.f32 %v739_v22, %v700_v21 }
 0x393   : > { %741 = vst.msk [vmem:[#allocation3] sm:$0x3] %vm698_vm9, %v740_v23 }
 0x394   : > { %v748_v31 = vld [vmem:[#allocation2] sm:$0x3] }
 0x39a   : > { %v746_v24 = vld [vmem:[#allocation3] sm:$0x3] }
 0x39b   : > { %vm751_vm10 = vcmp.gt.f32.partialorder %v746_v24, 0.0  ;;  %v747_v26 = vmax.f32 %v746_v24, 1.0 }
 0x39c   : > { %v1012_v28 = vsel %vm751_vm10, 1.0, %v1418_v27 }
 0x39d   : > { %v755_v29 = vmul.f32 %v1012_v28, %v754_v25  ;;  %1228 = vrcp.f32 %v747_v26 }
 0x39f   : > { %v756_v30 = vsel %vm698_vm9, %v755_v29, 0.0 }
 0x3a0   : > { %757 = vadd.xlane.f32.xlu0 %v756_v30 }
 0x3a7   : > { %v1229_v32 = vpop.eup %1228 }
 0x3a8   : > { %v750_v33 = vmul.f32 %v1229_v32, %v748_v31 }
 0x3aa   : > { %v768_v34 = vmul.f32 %v755_v29, %v750_v33 }
 0x3ac   : > { %v770_v35 = vsel %vm698_vm9, %v768_v34, 0.0  ;;  %769 = vst.msk [vmem:[%s1710_s4] sm:$0x3] %vm698_vm9, %v768_v34 }
 0x3ad   : > { %771 = vadd.xlane.f32.xlu0 %v770_v35 }
 0x42d   : > { %v758_v36 = vpop.xlane.xlu0 %757 }
 0x42e   : > { %v759_v37 = vrot.slane %v758_v36, 4 }
 0x430   : > { %v760_v38 = vadd.f32 %v759_v37, %v758_v36 }
 0x432   : > { %v761_v39 = vrot.slane %v760_v38, 2 }
 0x434   : > { %v762_v40 = vadd.f32 %v761_v39, %v760_v38 }
 0x436   : > { %v763_v41 = vrot.slane %v762_v40, 1 }
 0x438   : > { %v764_v42 = vadd.f32 %v763_v41, %v762_v40 }
 0x43a   : > { %1032 = vpush %v764_v42  ;;  %v772_v43 = vpop.xlane.xlu0 %771 }
 0x43b   : > { %v773_v45 = vrot.slane %v772_v43, 4 }
 0x43d   : > { %v774_v46 = vadd.f32 %v773_v45, %v772_v43 }
 0x43f   : > { %v775_v47 = vrot.slane %v774_v46, 2 }
 0x441   : > { %v776_v48 = vadd.f32 %v775_v47, %v774_v46 }
 0x443   : > { %v777_v49 = vrot.slane %v776_v48, 1 }
 0x445   : > { %v778_v50 = vadd.f32 %v777_v49, %v776_v48 }
 0x447   : > { %1034 = vpush %v778_v50 }
 0x46b   : > { %s1033_s28 = spop %1032 }
 0x46c   : > { %v766_v51 = vstv %s1033_s28 }
 0x46d   : > { %v767_v52 = vmax.f32 %v766_v51, 1e-08 }
 0x46f   : > { %1230 = vrcp.f32 %v767_v52 }
 0x478   : > { %s1035_s29 = spop %1034 }
 0x479   : > { %v1231_v53 = vpop.eup %1230  ;;  %v780_v54 = vstv %s1035_s29 }
 0x47a   : > { %v782_v55 = vmul.f32 %v1231_v53, %v780_v54 }
 0x47c   : > { %784 = vst.msk [vmem:[#allocation6] sm:$0x1] %vm783_vm11, %v782_v55 }
 0x47d PF: > { %p1040_p12 = scmp.eq.s32.totalorder %s1461_s18, 2  ;;  %s1419_s30 = smov [#allocation6]  }
 0x47e   : > { %s792_s27 = sshll.u32 %s1419_s30, 4  ;;  %s793_s27 = int_to_ptr.vmem [resolvable:$true] %s792_s27 }
 0x47f   : > { %s1232_s5 = scalar_lea.vmem %s793_s27, 16  ;;  %s1238_s6 = scalar_lea.vmem %s793_s27, 32 }
 0x480   : > { %p1233_p13 = scmp.ne.s32.totalorder %s793_s27, %s1232_s5  ;;  %p1239_p2 = scmp.lt.s32.totalorder %s793_s27, %s793_s27 }
 0x481   : > { %p1240_p3 = scmp.lt.s32.totalorder %s1238_s6, %s1232_s5 }
 0x482   : > { %p1234_p0 = pnand %p1233_p13, %p1040_p12 }
 0x483   : > { %p1241_p4 = por %p1240_p3, %p1239_p2 }
 0x484   : > { %p1235_p1 = pneg %p1234_p0 }
 0x486   : > { %p1242_p5 = pnand %p1241_p4, %p1235_p1 }
 0x488   : > { %1245 = shalt.err (!%p1242_p5)
}
 0x489   : > { %s1246_s10 = scalar_lea.hbm %s1709_s3, 16 }
 0x48a   : > { %p1247_p6 = scmp.ne.s32.totalorder %s1709_s3, %s1246_s10  ;;  %p1252_p9 = scmp.lt.u32.totalorder %s1246_s10, %s1709_s3 }
 0x48c   : > { %p1248_p7 = pnand %p1247_p6, %p1040_p12 }
 0x48e   : > { %p1249_p8 = pneg %p1248_p7 }
 0x490   : > { %p1254_p10 = pnand %p1252_p9, %p1249_p8 }
 0x492   : > { %1257 = shalt.err (!%p1254_p10)
}
 0x493   : > { %1037 = dma.vmem_to_hbm [thread:$0]  (%p1040_p12), %s793_s27, 16, %s1709_s3, [#allocation7]  }
 0x494   : > { %1335 = dma.done.wait (%p1040_p12), [#allocation7], 16  }
 0x495   : > { %1337 = vsyncadd (%p1040_p12), [#allocation7], 4294967280 }
 0x496 PF: > { %p13_p11 = scmp.ge.s32.totalorder %s1464_s19, 5   ;;  %s1722_s15 = smov %s1344_s16 }
 0x497   : > { %s1723_s16 = smov %s1473_s22  ;;  %s1724_s17 = smov %s1464_s19 }
 0x498   :  { %15 = sbr.rel (!%p13_p11) target bundleno = 2 (0x2), region = 268 }
 0x49f   :  { %811 = vsyncpa [#allocation7], 1 }
 0x4a0   :  { %813 = vsyncpa [#allocation7 + $0x1], 1 }

</bundles_post_ra>
